<compile_context>
chip_gen: v6e
topology: v6e:2x2x1
jax: 0.10.0
libtpu: 0.0.40
codegen_flags: <defaults>
</compile_context>

<pallas_src>
import jax
import jax.numpy as jnp
from jax.experimental import pallas as pl
from jax.experimental.pallas import tpu as pltpu


def mlp_kernel(x_ref, w1_ref, b1_ref, w2_ref, b2_ref, o_ref):
    # x: (TB, D*D), w1: (D*D, HP), b1: (1, HP), w2: (1, HP), b2: (1, 1) -> o: (1, TB)
    h = jnp.dot(
        x_ref[...],
        w1_ref[...],
        preferred_element_type=jnp.float32,
        precision=jax.lax.Precision.HIGHEST,
    )
    h = jnp.maximum(h + b1_ref[...], 0.0)  # ReLU
    # TODO(synk): nn.Dropout(0.5) is identity in eval mode; training-mode masking not implemented.
    # Layer 2: reduce over the hidden (lane) axis first (VPU mul + XLU lane reduce,
    # w2 row sublane-broadcasts for free), then relayout only the (TB, 1) column to
    # the lane-dense (1, TB) output row.
    y = jnp.sum(h * w2_ref[...], axis=1, keepdims=True) + b2_ref[...]  # (TB, 1)
    o_ref[...] = jax.nn.sigmoid(y).T.astype(o_ref.dtype)               # (1, TB)


def prepare_params(w1, b1, w2, b2, matrix_dim):
    """One-time host-side transform of PyTorch-layout Linear params.

    w1: (H, F) nn.Linear weight (out, in), b1: (H,), w2: (1, H), b2: (1,).
    Scatters W1 over the full D*D input space (non-triu rows are zero) using the
    same row-major (row, col) ordering as torch.triu_indices, zero-pads the hidden
    dim H up to a multiple of 128, and stores w2 as a (1, HP) row.
    """
    D = matrix_dim
    H, F = w1.shape
    DD = D * D
    HP = max(128, ((H + 127) // 128) * 128)
    iu = jnp.triu_indices(D)
    rows = iu[0] * D + iu[1]  # row-major (i, j) -> i*D + j, matches torch.triu_indices order
    w1_s = jnp.zeros((DD, HP), jnp.float32).at[rows, :H].set(w1.T.astype(jnp.float32))
    b1_p = jnp.zeros((1, HP), jnp.float32).at[0, :H].set(b1.astype(jnp.float32))
    w2_p = jnp.zeros((1, HP), jnp.float32).at[0, :H].set(w2.reshape(-1).astype(jnp.float32))
    b2_p = b2.reshape(1, 1).astype(jnp.float32)
    return w1_s, b1_p, w2_p, b2_p


def _pick_batch_tile(B):
    if B <= 256:
        # Single tile: the (1, tb) output block equals the full padded array, so tb
        # only needs sublane (8) alignment, not 128 lanes. Avoids 64x padded work at B=2.
        return max(8, ((B + 7) // 8) * 8)
    # Large B: big tiles amortize the ~0.35us/step pipeline overhead, but keep ~>=4
    # blocks so the "parallel" batch axis can shard across TensorCores (v7x), and cap
    # at 2048 rows (x tile = tb*256*4 B, double-buffered -> <=4 MiB, safe for v7x's
    # 64 MiB VMEM / 32 MiB default scoped limit).
    return max(128, min(2048, pl.next_power_of_2(pl.cdiv(B, 4))))


def mlp_forward(sim_matrices, params, *, tb=None):
    B, D, _ = sim_matrices.shape
    DD = D * D
    w1_s, b1_p, w2_p, b2_p = params
    HP = w1_s.shape[1]

    if tb is None:
        tb = _pick_batch_tile(B)

    x = sim_matrices.reshape(B, DD)            # free reshape, no gather
    b_pad = pl.cdiv(B, tb) * tb
    if b_pad != B:
        x = jnp.pad(x, ((0, b_pad - B), (0, 0)))

    grid = (b_pad // tb,)
    mxu_passes = 6  # Precision.HIGHEST f32 ~= 6 bf16 MXU passes
    cost = pl.CostEstimate(
        flops=mxu_passes * 2 * b_pad * DD * HP + 4 * b_pad * HP,
        transcendentals=b_pad,
        bytes_accessed=4 * (b_pad * DD + DD * HP + 2 * HP + 1 + b_pad),
    )

    out = pl.pallas_call(
        mlp_kernel,
        out_shape=jax.ShapeDtypeStruct((1, b_pad), jnp.float32),
        grid=grid,
        in_specs=[
            pl.BlockSpec((tb, DD), lambda i: (i, 0)),   # x: blocked over batch
            pl.BlockSpec((DD, HP), lambda i: (0, 0)),   # W1 scattered+padded, resident
            pl.BlockSpec((1, HP), lambda i: (0, 0)),    # b1 row
            pl.BlockSpec((1, HP), lambda i: (0, 0)),    # w2 row (lane layout)
            pl.BlockSpec((1, 1), lambda i: (0, 0)),     # b2
        ],
        out_specs=pl.BlockSpec((1, tb), lambda i: (0, i)),  # lane-dense output row
        compiler_params=pltpu.CompilerParams(
            dimension_semantics=("parallel",)),
        cost_estimate=cost,
    )(x, w1_s, b1_p, w2_p, b2_p)

    return out[0, :B].reshape(B, 1)


if __name__ == "__main__":
    # Module config: matrix_dim=16, n_layers=2, layer_size_factor=[1, 5]
    D = 16
    B = 2
    F = D * (D + 1) // 2          # 136
    H = F // 5                    # 27

    key = jax.random.PRNGKey(0)
    k_x, k_w1, k_b1, k_w2, k_b2 = jax.random.split(key, 5)

    sim_matrices = jax.random.normal(k_x, (B, D, D), dtype=jnp.float32)

    # Parameters in nn.Linear layout: weight (out_features, in_features).
    lim1 = 1.0 / (F ** 0.5)
    w1 = jax.random.uniform(k_w1, (H, F), jnp.float32, -lim1, lim1)
    b1 = jax.random.uniform(k_b1, (H,), jnp.float32, -lim1, lim1)
    lim2 = 1.0 / (H ** 0.5)
    w2 = jax.random.uniform(k_w2, (1, H), jnp.float32, -lim2, lim2)
    b2 = jax.random.uniform(k_b2, (1,), jnp.float32, -lim2, lim2)

    params = prepare_params(w1, b1, w2, b2, D)
    out = mlp_forward(sim_matrices, params)
    jax.block_until_ready(out)

    # Reference: original triu-gather formulation in plain JAX (f32-exact matmuls).
    iu = jnp.triu_indices(D)
    x_ref = sim_matrices[:, iu[0], iu[1]]
    h_ref = jnp.maximum(
        jnp.dot(x_ref, w1.T, precision=jax.lax.Precision.HIGHEST) + b1, 0.0)
    y_ref = jax.nn.sigmoid(
        jnp.dot(h_ref, w2.T, precision=jax.lax.Precision.HIGHEST) + b2)

    assert out.shape == (B, 1)
    assert jnp.allclose(out, y_ref, atol=1e-5, rtol=1e-5)

    print("KERNEL_OK")
</pallas_src>

<mosaic_0001>
module attributes {stable_mosaic.version = 11 : i64} {
  func.func @mlp_kernel(%arg0: i32, %arg1: memref<8x256xf32, #tpu.memory_space<vmem>>, %arg2: memref<256x128xf32, #tpu.memory_space<vmem>>, %arg3: memref<1x128xf32, #tpu.memory_space<vmem>>, %arg4: memref<1x128xf32, #tpu.memory_space<vmem>>, %arg5: memref<1x1xf32, #tpu.memory_space<vmem>>, %arg6: memref<1x8xf32, #tpu.memory_space<vmem>>) attributes {dimension_semantics = [#tpu.dimension_semantics<parallel>], iteration_bounds = array<i64: 1>, scalar_prefetch = 0 : i64, scratch_operands = 0 : i64, tpu.core_type = #tpu.core_type<tc>, window_params = [{transform_indices = @transform_0, window_bounds = array<i64: 8, 256>}, {pipeline_mode = #tpu.pipeline_mode<synchronous>, transform_indices = @transform_1, window_bounds = array<i64: 256, 128>}, {pipeline_mode = #tpu.pipeline_mode<synchronous>, transform_indices = @transform_2, window_bounds = array<i64: 1, 128>}, {pipeline_mode = #tpu.pipeline_mode<synchronous>, transform_indices = @transform_3, window_bounds = array<i64: 1, 128>}, {pipeline_mode = #tpu.pipeline_mode<synchronous>, transform_indices = @transform_4, window_bounds = array<i64: 1, 1>}, {transform_indices = @transform_5, window_bounds = array<i64: 1, 8>}]} {
    %c0 = arith.constant 0 : index
    %c0_0 = arith.constant 0 : index
    %0 = vector.load %arg1[%c0, %c0_0] : memref<8x256xf32, #tpu.memory_space<vmem>>, vector<8x256xf32>
    %c0_1 = arith.constant 0 : index
    %c0_2 = arith.constant 0 : index
    %1 = vector.load %arg2[%c0_1, %c0_2] : memref<256x128xf32, #tpu.memory_space<vmem>>, vector<256x128xf32>
    %cst = arith.constant dense<0.000000e+00> : vector<8x128xf32>
    %2 = tpu.matmul %0, %1, %cst {dimension_numbers = #tpu.dot_dimension_numbers<[1], [0], [0], [1], [0, 0, 1, 1], [], []>, precision = #tpu.contract_precision<fp32>} : vector<8x256xf32>, vector<256x128xf32>, vector<8x128xf32> -> vector<8x128xf32>
    %c0_3 = arith.constant 0 : index
    %c0_4 = arith.constant 0 : index
    %3 = vector.load %arg3[%c0_3, %c0_4] : memref<1x128xf32, #tpu.memory_space<vmem>>, vector<1x128xf32>
    %4 = vector.broadcast %3 : vector<1x128xf32> to vector<8x128xf32>
    %5 = arith.addf %2, %4 : vector<8x128xf32>
    %cst_5 = arith.constant 0.000000e+00 : f32
    %6 = vector.broadcast %cst_5 : f32 to vector<8x128xf32>
    %7 = arith.maximumf %5, %6 : vector<8x128xf32>
    %c0_6 = arith.constant 0 : index
    %c0_7 = arith.constant 0 : index
    %8 = vector.load %arg4[%c0_6, %c0_7] : memref<1x128xf32, #tpu.memory_space<vmem>>, vector<1x128xf32>
    %9 = vector.broadcast %8 : vector<1x128xf32> to vector<8x128xf32>
    %10 = arith.mulf %7, %9 : vector<8x128xf32>
    %cst_8 = arith.constant dense<0.000000e+00> : vector<8xf32>
    %11 = vector.multi_reduction <add>, %10, %cst_8 [1] : vector<8x128xf32> to vector<8xf32>
    %12 = vector.shape_cast %11 : vector<8xf32> to vector<8x1xf32>
    %c0_9 = arith.constant 0 : index
    %c0_10 = arith.constant 0 : index
    %13 = vector.load %arg5[%c0_9, %c0_10] : memref<1x1xf32, #tpu.memory_space<vmem>>, vector<1x1xf32>
    %14 = vector.broadcast %13 : vector<1x1xf32> to vector<8x1xf32>
    %15 = arith.addf %12, %14 : vector<8x1xf32>
    %16 = arith.negf %15 : vector<8x1xf32>
    %17 = math.exp %16 : vector<8x1xf32>
    %cst_11 = arith.constant 1.000000e+00 : f32
    %18 = vector.broadcast %cst_11 : f32 to vector<8x1xf32>
    %19 = arith.addf %18, %17 : vector<8x1xf32>
    %20 = arith.divf %18, %19 : vector<8x1xf32>
    %21 = tpu.transpose %20, [1, 0] : vector<8x1xf32> -> vector<1x8xf32>
    %c0_12 = arith.constant 0 : index
    %c0_13 = arith.constant 0 : index
    %22 = vector.load %arg6[%c0_12, %c0_13] : memref<1x8xf32, #tpu.memory_space<vmem>>, vector<1x8xf32>
    tpu.vector_store %arg6[%c0_12, %c0_13], %21 {strides = array<i32>} : memref<1x8xf32, #tpu.memory_space<vmem>>, vector<1x8xf32>,
    return
  }
  func.func @transform_0(%arg0: i32) -> (i32, i32) {
    %c0_i32 = arith.constant 0 : i32
    %c0_i32_0 = arith.constant 0 : i32
    return %arg0, %c0_i32 : i32, i32
  }
  func.func @transform_1(%arg0: i32) -> (i32, i32) {
    %c0_i32 = arith.constant 0 : i32
    %c0_i32_0 = arith.constant 0 : i32
    %c0_i32_1 = arith.constant 0 : i32
    return %c0_i32, %c0_i32_0 : i32, i32
  }
  func.func @transform_2(%arg0: i32) -> (i32, i32) {
    %c0_i32 = arith.constant 0 : i32
    %c0_i32_0 = arith.constant 0 : i32
    %c0_i32_1 = arith.constant 0 : i32
    return %c0_i32, %c0_i32_0 : i32, i32
  }
  func.func @transform_3(%arg0: i32) -> (i32, i32) {
    %c0_i32 = arith.constant 0 : i32
    %c0_i32_0 = arith.constant 0 : i32
    %c0_i32_1 = arith.constant 0 : i32
    return %c0_i32, %c0_i32_0 : i32, i32
  }
  func.func @transform_4(%arg0: i32) -> (i32, i32) {
    %c0_i32 = arith.constant 0 : i32
    %c0_i32_0 = arith.constant 0 : i32
    %c0_i32_1 = arith.constant 0 : i32
    return %c0_i32, %c0_i32_0 : i32, i32
  }
  func.func @transform_5(%arg0: i32) -> (i32, i32) {
    %c0_i32 = arith.constant 0 : i32
    %c0_i32_0 = arith.constant 0 : i32
    return %c0_i32, %arg0 : i32, i32
  }
}

</mosaic_0001>

<bundles_post_ra>
// kernel: tpu_custom_call.1
= control target key start
LH: loop header
LB: loop body
LE: loop exit
PB: predicated region body
PF: predicated region fallthrough
CT: control target
= control target key end

     0   :  { %s1972_s0 = inlined_call_operand.hbm [shape: f32[8,256], index: 0, kind: input, shape index: {}]   ;;  %s1973_s1 = inlined_call_operand.hbm [shape: f32[256,128], index: 1, kind: input, shape index: {}]   ;;  %s1974_s2 = inlined_call_operand.vmem [shape: f32[1,128], index: 2, kind: input, shape index: {}]   ;;  %s1975_s3 = inlined_call_operand.vmem [shape: f32[1,128], index: 3, kind: input, shape index: {}]   ;;  %s1976_s4 = inlined_call_operand.<no memory space> [shape: f32[1,1], index: 4, kind: input, shape index: {}]   ;;  %s1977_s5 = inlined_call_operand.hbm [shape: f32[1,8], index: 5, kind: output, shape index: {}]  }
   0x1   :  { %v10_v0 = vstv %s1976_s4 }
   0x2   :  { %11 = vst [vmem:[#allocation2] sm:$0x1] %v10_v0 }
   0x3   :  { %12 = vsyncpa [#allocation4], 0 }
   0x4   :  { %13 = vsyncpa [#allocation7], 0 }
   0x5   :  { %14 = vsyncpa [#allocation5], 0  ;;  %s1317_s20 = smov [#allocation3]   ;;  %s1318_s22 = smov [#allocation6]  }
   0x6   :  { %s21_s21 = sshll.u32 %s1317_s20, 4  ;;  %s30_s23 = sshll.u32 %s1318_s22, 4  ;;  %s22_s21 = int_to_ptr.vmem [resolvable:$true] %s21_s21  ;;  %s31_s23 = int_to_ptr.vmem [resolvable:$true] %s30_s23 }
   0x7   :  { %s1259_s24 = scalar_lea.vmem %s22_s21, 256  ;;  %p1264_p1 = scmp.lt.s32.totalorder %s22_s21, %s22_s21 }
   0x8   :  { %p1260_p0 = scmp.ne.s32.totalorder %s22_s21, %s1259_s24  ;;  %p1265_p2 = scmp.lt.s32.totalorder %s1259_s24, %s1259_s24 }
   0xa   :  { %p1266_p3 = por %p1265_p2, %p1264_p1 }
   0xc   :  { %p1267_p4 = pnand %p1266_p3, %p1260_p0 }
   0xe   :  { %1270 = shalt.err (!%p1267_p4)
}
   0xf   :  { %24 = dma.hbm_to_vmem [thread:$0]  %s1972_s0, 256, %s22_s21, [#allocation4]  }
  0x10   :  { %s1279_s4 = scalar_lea.vmem %s31_s23, 4096  ;;  %p1284_p6 = scmp.lt.s32.totalorder %s31_s23, %s31_s23 }
  0x11   :  { %p1280_p5 = scmp.ne.s32.totalorder %s31_s23, %s1279_s4  ;;  %p1285_p7 = scmp.lt.s32.totalorder %s1279_s4, %s1279_s4 }
  0x13   :  { %p1286_p8 = por %p1285_p7, %p1284_p6 }
  0x15   :  { %p1287_p9 = pnand %p1286_p8, %p1280_p5 }
  0x17   :  { %1290 = shalt.err (!%p1287_p9)
}
  0x18   :  { %s1319_s27 = smov 128   ;;  %s1320_s28 = smov 8  }
  0x19   :  { %36 = dma.hbm_to_vmem [thread:$0]  %s1973_s1, 4096, %s31_s23, [#allocation7], %s1319_s27, %s1319_s27, %s1320_s28  }
  0x1a   :  { %1311 = dma.done.wait [#allocation4], 256  }
  0x1b   :  { %1312 = vsyncadd [#allocation4], 4294967040 }
  0x1c   :  { %1313 = dma.done.wait [#allocation7], 4096  }
  0x1d   :  { %1314 = vsyncadd [#allocation7], 4294963200  ;;  %v82_v1 = vld [vmem:[#allocation6 + $0xf8] sm:$0xff]  ;;  %v81_v3 = vld [vmem:[#allocation6 + $0xf0] sm:$0xff]  ;;  %s1321_s7 = smov [#allocation8]   ;;  %vm1009_vm0 = vcmask 57344  }
  0x1e   :  { %v66_v2 = vld [vmem:[#allocation6 + $0x78] sm:$0xff]  ;;  %v1361_v4 = vand.u32 4294901760, %v82_v1  ;;  %v1365_v6 = vand.u32 4294901760, %v81_v3  ;;  %v65_v7 = vld [vmem:[#allocation6 + $0x70] sm:$0xff]  ;;  %v80_v8 = vld [vmem:[#allocation6 + $0xe8] sm:$0xff]  ;;  %s1017_s8 = sshll.u32 %s1321_s7, 4  ;;  %s1018_s8 = int_to_ptr.vmem [resolvable:$true] %s1017_s8 }
  0x1f   :  { %v1363_v5 = vand.u32 4294901760, %v66_v2  ;;  %v64_v9 = vld [vmem:[#allocation6 + $0x68] sm:$0xff]  ;;  %v1367_v10 = vand.u32 4294901760, %v65_v7  ;;  %v1369_v11 = vand.u32 4294901760, %v80_v8  ;;  %v79_v13 = vld [vmem:[#allocation6 + $0xe0] sm:$0xff]  ;;  %v78_v15 = vld [vmem:[#allocation6 + $0xd8] sm:$0xff]  ;;  %p1296_p11 = scmp.lt.s32.totalorder %s1018_s8, %s1018_s8 }
  0x20   :  { %v1371_v12 = vand.u32 4294901760, %v64_v9  ;;  %v63_v14 = vld [vmem:[#allocation6 + $0x60] sm:$0xff]  ;;  %1031 = vmatprep.subr.mxu0 %v1361_v4  ;;  %v1374_v16 = vand.u32 4294901760, %v79_v13  ;;  %v1378_v18 = vand.u32 4294901760, %v78_v15  ;;  %v1381_v19 = vsub.f32 %v82_v1, %v1361_v4  ;;  %v1383_v20 = vld [vmem:[#allocation6 + $0x58] sm:$0xff]  ;;  %v1385_v21 = vld [vmem:[#allocation6 + $0xd0] sm:$0xff] }
  0x21   :  { %v1376_v17 = vand.u32 4294901760, %v63_v14  ;;  %v1387_v22 = vld [vmem:[#allocation6 + $0x50] sm:$0xff]  ;;  %1032 = vmatpush3.msra.mxu0 %v1363_v5  ;;  %v1391_v23 = vand.u32 4294901760, %v1383_v20  ;;  %v1394_v24 = vsub.f32 %v66_v2, %v1363_v5  ;;  %v1397_v25 = vand.u32 4294901760, %v1385_v21  ;;  %v1402_v27 = vld [vmem:[#allocation6 + $0xc8] sm:$0xff]  ;;  %v1406_v29 = vld [vmem:[#allocation6 + $0xc0] sm:$0xff] }
  0x22   :  { %v1400_v26 = vsub.f32 %v81_v3, %v1365_v6  ;;  %v1404_v28 = vld [vmem:[#allocation6 + $0x48] sm:$0xff]  ;;  %1033 = vmatprep.subr.mxu0 %v1365_v6  ;;  %v1991_v30 = vand.u32 4294901760, %v1381_v19  ;;  %v1411_v31 = vand.u32 4294901760, %v1387_v22  ;;  %v1414_v32 = vsub.f32 %v65_v7, %v1367_v10  ;;  %v1428_v38 = vld [vmem:[#allocation6 + $0x40] sm:$0xff]  ;;  %v1452_v47 = vld [vmem:[#allocation6 + $0xb8] sm:$0xff]  ;;  %s1295_s9 = scalar_lea.vmem %s1018_s8, 32 }
  0x23   :  { %2046 = vst [vmem:[#allocation12_spill] sm:$0xff] %v1397_v25  ;;  %v1417_v33 = vand.u32 4294901760, %v1402_v27  ;;  %1034 = vmatpush3.msra.mxu0 %v1367_v10  ;;  %v1989_v34 = vand.u32 4294901760, %v1394_v24  ;;  %v1423_v36 = vsub.f32 %v80_v8, %v1369_v11  ;;  %v1426_v37 = vand.u32 4294901760, %v1404_v28  ;;  %v1462_v52 = vld [vmem:[#allocation6 + $0x38] sm:$0xff]  ;;  %v1469_v57 = vld [vmem:[#allocation6 + $0xb0] sm:$0xff] }
  0x24   :  { %2047 = vst [vmem:[#allocation13_spill] sm:$0xff] %v1411_v31  ;;  %v1988_v35 = vand.u32 4294901760, %v1400_v26  ;;  %1035 = vmatprep.subr.mxu0 %v1369_v11  ;;  %v318_v39 = vsub.f32 %v1381_v19, %v1991_v30  ;;  %v1986_v40 = vand.u32 4294901760, %v1414_v32  ;;  %v1436_v41 = vsub.f32 %v64_v9, %v1371_v12  ;;  %v1481_v62 = vld [vmem:[#allocation6 + $0x30] sm:$0xff]  ;;  %v1493_v3 = vld [vmem:[#allocation6 + $0xa8] sm:$0xff] }
  0x25   :  { %2048 = vst [vmem:[#allocation14_spill] sm:$0xff] %v1417_v33  ;;  %2049 = vst [vmem:[#allocation15_spill] sm:$0xff] %v1426_v37  ;;  %v1439_v42 = vand.u32 4294901760, %v1406_v29  ;;  %1036 = vmatpush3.msra.mxu0 %v1371_v12  ;;  %v206_v43 = vsub.f32 %v1394_v24, %v1989_v34  ;;  %v1984_v45 = vand.u32 4294901760, %v1423_v36  ;;  %v1450_v46 = vsub.f32 %v79_v13, %v1374_v16 }
  0x26   :  { %v325_v44 = vsub.f32 %v1400_v26, %v1988_v35  ;;  %1037 = vmatprep.subr.mxu0 %v1374_v16  ;;  %v319_v48 = vand.u32 4294901760, %v318_v39  ;;  %v213_v49 = vsub.f32 %v1414_v32, %v1986_v40  ;;  %v1983_v50 = vand.u32 4294901760, %v1436_v41  ;;  %v1584_v40 = vld [vmem:[#allocation6 + $0x90] sm:$0xff] }
  0x27   :  { %2050 = vst [vmem:[#allocation16_spill] sm:$0xff] %v1439_v42  ;;  %v1460_v51 = vand.u32 4294901760, %v1428_v38  ;;  %1038 = vmatpush3.msra.mxu0 %v1376_v17  ;;  %v207_v53 = vand.u32 4294901760, %v206_v43  ;;  %v332_v55 = vsub.f32 %v1423_v36, %v1984_v45  ;;  %v1981_v56 = vand.u32 4294901760, %v1450_v46  ;;  %v1594_v35 = vld [vmem:[#allocation6 + $0x10] sm:$0xff] }
  0x28   :  { %v326_v54 = vand.u32 4294901760, %v325_v44  ;;  %1039 = vmatprep.subr.mxu0 %v1378_v18  ;;  %1066 = vmatprep.subr.mxu1 %v319_v48  ;;  %v214_v58 = vand.u32 4294901760, %v213_v49  ;;  %v220_v59 = vsub.f32 %v1436_v41, %v1983_v50  ;;  %v1476_v60 = vsub.f32 %v63_v14, %v1376_v17  ;;  %v1504_v14 = vld [vmem:[#allocation6 + $0x28] sm:$0xff]  ;;  %v1571_v50 = vld [vmem:[#allocation6 + $0x18] sm:$0xff] }
  0x29   :  { %2051 = vst [vmem:[#allocation17_spill] sm:$0xff] %v1460_v51  ;;  %v1479_v61 = vand.u32 4294901760, %v1452_v47  ;;  %1040 = vmatpush3.msra.mxu0 %v1391_v23  ;;  %1067 = vmatpush3.msra.mxu1 %v207_v53  ;;  %v333_v63 = vand.u32 4294901760, %v332_v55  ;;  %v339_v0 = vsub.f32 %v1450_v46, %v1981_v56  ;;  %v1488_v1 = vsub.f32 %v78_v15, %v1378_v18 }
  0x2a   :  { %v1491_v2 = vand.u32 4294901760, %v1462_v52  ;;  %1041 = vmatprep.subr.mxu0 %v1397_v25  ;;  %1068 = vmatprep.subr.mxu1 %v326_v54  ;;  %v221_v7 = vand.u32 4294901760, %v220_v59  ;;  %v1979_v8 = vand.u32 4294901760, %v1476_v60  ;;  %v1499_v9 = vsub.f32 %v1383_v20, %v1391_v23 }
  0x2b   :  { %2052 = vst [vmem:[#allocation18_spill] sm:$0xff] %v1479_v61  ;;  %v1502_v13 = vand.u32 4294901760, %v1469_v57  ;;  %1042 = vmatpush3.msra.mxu0 %v1411_v31  ;;  %1069 = vmatpush3.msra.mxu1 %v214_v58  ;;  %v340_v15 = vand.u32 4294901760, %v339_v0  ;;  %v1978_v39 = vand.u32 4294901760, %v1488_v1  ;;  %v1510_v43 = vsub.f32 %v1385_v21, %v1397_v25  ;;  %v1527_v21 = vld [vmem:[#allocation6 + $0xa0] sm:$0xff] }
  0x2c   :  { %2053 = vst [vmem:[#allocation19_spill] sm:$0xff] %v1491_v2  ;;  %v1513_v44 = vand.u32 4294901760, %v1481_v62  ;;  %1043 = vmatprep.subr.mxu0 %v1417_v33  ;;  %1070 = vmatprep.subr.mxu1 %v333_v63  ;;  %v227_v20 = vsub.f32 %v1476_v60, %v1979_v8  ;;  %v1980_v48 = vand.u32 4294901760, %v1499_v9  ;;  %v1522_v49 = vsub.f32 %v1387_v22, %v1411_v31 }
  0x2d   :  { %2054 = vst [vmem:[#allocation20_spill] sm:$0xff] %v1502_v13  ;;  %v1525_v53 = vand.u32 4294901760, %v1493_v3  ;;  %1044 = vmatpush3.msra.mxu0 %v1426_v37  ;;  %1071 = vmatpush3.msra.mxu1 %v221_v7  ;;  %v346_v54 = vsub.f32 %v1488_v1, %v1978_v39  ;;  %v1982_v55 = vand.u32 4294901760, %v1510_v43  ;;  %v1536_v58 = vsub.f32 %v1402_v27, %v1417_v33  ;;  %v1550_v39 = vld [vmem:[#allocation6 + $0x20] sm:$0xff] }
  0x2e   :  { %2055 = vst [vmem:[#allocation21_spill] sm:$0xff] %v1513_v44  ;;  %v1539_v22 = vand.u32 4294901760, %v1504_v14  ;;  %1045 = vmatprep.subr.mxu0 %v1439_v42  ;;  %1072 = vmatprep.subr.mxu1 %v340_v15  ;;  %v228_v59 = vand.u32 4294901760, %v227_v20  ;;  %v234_v63 = vsub.f32 %v1499_v9, %v1980_v48  ;;  %v1985_v0 = vand.u32 4294901760, %v1522_v49  ;;  %v1560_v48 = vld [vmem:[#allocation6 + $0x98] sm:$0xff] }
  0x2f   :  { %2056 = vst [vmem:[#allocation22_spill] sm:$0xff] %v1525_v53  ;;  %v1548_v7 = vsub.f32 %v1404_v28, %v1426_v37  ;;  %1046 = vmatpush3.msra.mxu0 %v1460_v51  ;;  %v347_v27 = vand.u32 4294901760, %v346_v54  ;;  %v353_v15 = vsub.f32 %v1510_v43, %v1982_v55  ;;  %v1987_v20 = vand.u32 4294901760, %v1536_v58  ;;  %v50_v37 = vld [vmem:[#allocation3 + $0x8] sm:$0xff] }
  0x30   :  { %2057 = vst [vmem:[#allocation23_spill] sm:$0xff] %v1539_v22  ;;  %v1558_v8 = vand.u32 4294901760, %v1527_v21  ;;  %1073 = vmatpush3.msra.mxu1 %v228_v59  ;;  %1047 = vmatprep.subr.mxu0 %v1479_v61  ;;  %v235_v28 = vand.u32 4294901760, %v234_v63  ;;  %v241_v56 = vsub.f32 %v1522_v49, %v1985_v0  ;;  %v1569_v55 = vsub.f32 %v1406_v29, %v1439_v42 }
  0x31   :  { %v1990_v54 = vand.u32 4294901760, %v1548_v7  ;;  %1074 = vmatprep.subr.mxu1 %v347_v27  ;;  %1048 = vmatpush3.msra.mxu0 %v1491_v2  ;;  %v354_v45 = vand.u32 4294901760, %v353_v15  ;;  %v360_v59 = vsub.f32 %v1536_v58, %v1987_v20  ;;  %v1578_v63 = vand.u32 4294901760, %v1550_v39 }
  0x32   :  { %2058 = vst [vmem:[#allocation24_spill] sm:$0xff] %v1558_v8  ;;  %v1582_v0 = vsub.f32 %v1428_v38, %v1460_v51  ;;  %1075 = vmatpush3.msra.mxu1 %v235_v28  ;;  %1049 = vmatprep.subr.mxu0 %v1502_v13  ;;  %v242_v29 = vand.u32 4294901760, %v241_v56  ;;  %v1994_v15 = vand.u32 4294901760, %v1569_v55  ;;  %v1592_v20 = vand.u32 4294901760, %v1560_v48 }
  0x33   :  { %2059 = vst [vmem:[#allocation25_spill] sm:$0xff] %v1578_v63  ;;  %v248_v27 = vsub.f32 %v1548_v7, %v1990_v54  ;;  %1076 = vmatprep.subr.mxu1 %v354_v45  ;;  %1050 = vmatpush3.msra.mxu0 %v1513_v44  ;;  %v361_v38 = vand.u32 4294901760, %v360_v59  ;;  %v1600_v56 = vsub.f32 %v1452_v47, %v1479_v61  ;;  %v1603_v34 = vand.u32 4294901760, %v1571_v50  ;;  %v1605_v54 = vld [vmem:[#allocation6 + $0x88] sm:$0xff] }
  0x34   :  { %v1997_v28 = vand.u32 4294901760, %v1582_v0  ;;  %1077 = vmatpush3.msra.mxu1 %v242_v29  ;;  %1051 = vmatprep.subr.mxu0 %v1525_v53  ;;  %v367_v45 = vsub.f32 %v1569_v55, %v1994_v15  ;;  %v1613_v59 = vsub.f32 %v1462_v52, %v1491_v2  ;;  %v1616_v47 = vand.u32 4294901760, %v1584_v40  ;;  %v1630_v52 = vld [vmem:[#allocation6 + $0x8] sm:$0xff] }
  0x35   :  { %2060 = vst [vmem:[#allocation26_spill] sm:$0xff] %v1603_v34  ;;  %v249_v30 = vand.u32 4294901760, %v248_v27  ;;  %1078 = vmatprep.subr.mxu1 %v361_v38  ;;  %1052 = vmatpush3.msra.mxu0 %v1539_v22  ;;  %v1625_v61 = vsub.f32 %v1469_v57, %v1502_v13  ;;  %v1628_v15 = vand.u32 4294901760, %v1594_v35  ;;  %v1639_v27 = vand.u32 4294901760, %v1605_v54  ;;  %v1641_v57 = vld [vmem:[#allocation6 + $0x80] sm:$0xff] }
  0x36   :  { %2061 = vst [vmem:[#allocation27_spill] sm:$0xff] %v1616_v47  ;;  %v255_v29 = vsub.f32 %v1582_v0, %v1997_v28  ;;  %1053 = vmatprep.subr.mxu0 %v1558_v8  ;;  %v368_v38 = vand.u32 4294901760, %v367_v45  ;;  %v1636_v28 = vsub.f32 %v1481_v62, %v1513_v44  ;;  %v2064_v51 = vand.u32 4294901760, %v1600_v56  ;;  %v1664_v45 = vld [vmem:[#allocation6] sm:$0xff] }
  0x37   :  { %2062 = vst [vmem:[#allocation28_spill] sm:$0xff] %v1628_v15  ;;  %1079 = vmatpush3.msra.mxu1 %v249_v30  ;;  %2063 = vst [vmem:[#allocation29_spill] sm:$0xff] %v1639_v27  ;;  %1054 = vmatpush3.msra.mxu0 %v1578_v63  ;;  %v1650_v2 = vsub.f32 %v1493_v3, %v1525_v53  ;;  %v2066_v62 = vand.u32 4294901760, %v1613_v59  ;;  %v1672_v42 = vand.u32 4294901760, %v1641_v57  ;;  %v1688_v25 = vand.u32 4294901760, %v1664_v45 }
  0x38   :  { %v256_v13 = vand.u32 4294901760, %v255_v29  ;;  %v374_v30 = vsub.f32 %v1600_v56, %v2064_v51  ;;  %1080 = vmatprep.subr.mxu1 %v368_v38  ;;  %1055 = vmatprep.subr.mxu0 %v1592_v20  ;;  %v1658_v29 = vand.u32 4294901760, %v1630_v52  ;;  %v1662_v51 = vsub.f32 %v1504_v14, %v1539_v22 }
  0x39   :  { %2065 = vst [vmem:[#allocation30_spill] sm:$0xff] %v1650_v2  ;;  %v262_v44 = vsub.f32 %v1613_v59, %v2066_v62  ;;  %1056 = vmatpush3.msra.mxu0 %v1603_v34  ;;  %v2067_v38 = vand.u32 4294901760, %v1625_v61  ;;  %v2068_v14 = vand.u32 4294901760, %v1636_v28  ;;  %v1681_v22 = vsub.f32 %v1527_v21, %v1558_v8 }
  0x3a   :  { %1081 = vmatpush3.msra.mxu1 %v256_v13  ;;  %v375_v3 = vand.u32 4294901760, %v374_v30  ;;  %1057 = vmatprep.subr.mxu0 %v1616_v47  ;;  %v2069_v31 = vand.u32 4294901760, %v1650_v2  ;;  %v2070_v21 = vand.u32 4294901760, %v1662_v51  ;;  %v1699_v8 = vand.u32 4294901760, %v50_v37 }
  0x3b   :  { %v381_v53 = vsub.f32 %v1625_v61, %v2067_v38  ;;  %v263_v33 = vand.u32 4294901760, %v262_v44  ;;  %v269_v13 = vsub.f32 %v1636_v28, %v2068_v14  ;;  %v49_v38 = vld [vmem:[#allocation3] sm:$0xff]  ;;  %1058 = vmatpush3.msra.mxu0 %v1628_v15  ;;  %v1692_v14 = vsub.f32 %v1550_v39, %v1578_v63 }
  0x3c   :  { %1082 = vmatprep.subr.mxu1 %v375_v3  ;;  %v388_v44 = vsub.f32 %v1650_v2, %v2069_v31  ;;  %1059 = vmatprep.subr.mxu0 %v1639_v27  ;;  %v2022_v3 = vand.u32 4294901760, %v1681_v22  ;;  %2071 = vst [vmem:[#allocation31_spill] sm:$0xff] %v1699_v8  ;;  %v1707_v39 = vand.u32 4294901760, %v49_v38 }
  0x3d   :  { %v382_v62 = vand.u32 4294901760, %v381_v53  ;;  %1083 = vmatpush3.msra.mxu1 %v263_v33  ;;  %v270_v30 = vand.u32 4294901760, %v269_v13  ;;  %v276_v53 = vsub.f32 %v1662_v51, %v2070_v21  ;;  %1060 = vmatpush3.msra.mxu0 %v1658_v29  ;;  %v2023_v2 = vand.u32 4294901760, %v1692_v14 }
  0x3e   :  { %v389_v31 = vand.u32 4294901760, %v388_v44  ;;  %v1705_v33 = vsub.f32 %v1560_v48, %v1592_v20  ;;  %2072 = vst [vmem:[#allocation32_spill] sm:$0xff] %v1707_v39  ;;  %1061 = vmatprep.subr.mxu0 %v1672_v42  ;;  %v395_v21 = vsub.f32 %v1681_v22, %v2022_v3  ;;  %v1718_v44 = vsub.f32 %v1571_v50, %v1603_v34 }
  0x3f   :  { %1084 = vmatprep.subr.mxu1 %v382_v62  ;;  %v277_v13 = vand.u32 4294901760, %v276_v53  ;;  %v1714_v62 = vsub.f32 %v50_v37, %v1699_v8  ;;  %1062 = vmatpush3.msra.mxu0 %v1688_v25  ;;  %v283_v48 = vsub.f32 %v1692_v14, %v2023_v2  ;;  %v1726_v53 = vsub.f32 %v49_v38, %v1707_v39 }
  0x40   :  { %1085 = vmatpush3.msra.mxu1 %v270_v30  ;;  %v1730_v37 = vsub.f32 %v1584_v40, %v1616_v47  ;;  %v396_v3 = vand.u32 4294901760, %v395_v21  ;;  %1101 = vmatprep.subr.mxu0 %v1381_v19  ;;  %v1737_v2 = vsub.f32 %v1594_v35, %v1628_v15  ;;  %v2073_v38 = vand.u32 4294901760, %v1705_v33 }
  0x41   :  { %1086 = vmatprep.subr.mxu1 %v389_v31  ;;  %v2028_v50 = vand.u32 4294901760, %v1714_v62  ;;  %v2031_v31 = vand.u32 4294901760, %v1718_v44  ;;  %v284_v30 = vand.u32 4294901760, %v283_v48  ;;  %427 = vmatprep.mubr.f32.mxu1 %v1699_v8  ;;  %v1764_v15 = vsub.f32 %v1630_v52, %v1658_v29 }
  0x42   :  { %1087 = vmatpush3.msra.mxu1 %v277_v13  ;;  %v402_v34 = vsub.f32 %v1705_v33, %v2073_v38  ;;  %v1754_v38 = vsub.f32 %v1605_v54, %v1639_v27  ;;  %v2074_v13 = vand.u32 4294901760, %v1726_v53  ;;  %v2075_v8 = vand.u32 4294901760, %v1730_v37 }
  0x43   :  { %1088 = vmatprep.subr.mxu1 %v396_v3  ;;  %v189_v21 = vsub.f32 %v1714_v62, %v2028_v50  ;;  %v290_v35 = vsub.f32 %v1718_v44, %v2031_v31  ;;  %2076 = vst [vmem:[#allocation33_spill] sm:$0xff] %v1764_v15  ;;  %v2077_v47 = vand.u32 4294901760, %v1737_v2 }
  0x44   :  { %1089 = vmatpush3.msra.mxu1 %v284_v30  ;;  %v403_v40 = vand.u32 4294901760, %v402_v34  ;;  %v195_v3 = vsub.f32 %v1726_v53, %v2074_v13  ;;  %v409_v50 = vsub.f32 %v1730_v37, %v2075_v8  ;;  %v2039_v34 = vand.u32 4294901760, %v1754_v38 }
  0x45   :  { %v190_v31 = vand.u32 4294901760, %v189_v21  ;;  %v291_v48 = vand.u32 4294901760, %v290_v35  ;;  %v297_v54 = vsub.f32 %v1737_v2, %v2077_v47  ;;  %v2038_v13 = vand.u32 4294901760, %v1764_v15 }
  0x46   :  { %1090 = vmatprep.subr.mxu1 %v403_v40  ;;  %v196_v30 = vand.u32 4294901760, %v195_v3  ;;  %v410_v27 = vand.u32 4294901760, %v409_v50  ;;  %v1773_v8 = vsub.f32 %v1641_v57, %v1672_v42  ;;  %v416_v21 = vsub.f32 %v1754_v38, %v2039_v34 }
  0x47   :  { %191 = vmatprep.mubr.f32.mxu0 %v190_v31  ;;  %1091 = vmatpush3.msra.mxu1 %v291_v48  ;;  %v298_v52 = vand.u32 4294901760, %v297_v54  ;;  %v1780_v47 = vsub.f32 %v1664_v45, %v1688_v25  ;;  %v304_v50 = vsub.f32 %v1764_v15, %v2038_v13  ;;  %v2080_v54 = vld [vmem:[#allocation12_spill] sm:$0xff]  ;;  %v2094_v34 = vand.u32 4294901760, %v1381_v19 }
  0x48   :  { %2078 = vst [vmem:[#allocation34_spill] sm:$0xff] %v1773_v8  ;;  %197 = vmatmul.mubr.f32.vlgmr.msra.gmra.mxu0 %v196_v30  ;;  %1092 = vmatprep.subr.mxu1 %v410_v27  ;;  %v2037_v57 = vand.u32 4294901760, %v1773_v8  ;;  %v417_v31 = vand.u32 4294901760, %v416_v21  ;;  %v2081_v30 = vld [vmem:[#allocation13_spill] sm:$0xff]  ;;  %v2083_v21 = vld [vmem:[#allocation14_spill] sm:$0xff]  ;;  %v2093_v13 = vld [vmem:[#allocation24_spill] sm:$0xff] }
  0x49   :  { %2079 = vst [vmem:[#allocation35_spill] sm:$0xff] %v1780_v47  ;;  %1102 = vmatpush3.msra.mxu0 %v1394_v24  ;;  %1093 = vmatpush3.msra.mxu1 %v298_v52  ;;  %v2036_v40 = vand.u32 4294901760, %v1780_v47  ;;  %v305_v35 = vand.u32 4294901760, %v304_v50  ;;  %v2082_v52 = vld [vmem:[#allocation30_spill] sm:$0xff]  ;;  %v2084_v50 = vld [vmem:[#allocation15_spill] sm:$0xff]  ;;  %v2102_v19 = vand.u32 4294901760, %v1423_v36 }
  0x4a   :  { %1103 = vmatprep.subr.mxu0 %v1400_v26  ;;  %v423_v45 = vsub.f32 %v1773_v8, %v2037_v57  ;;  %564 = vmatprep.mubr.f32.mxu0 %v1714_v62  ;;  %v2092_v57 = vld [vmem:[#allocation23_spill] sm:$0xff] }
  0x4b   :  { %1104 = vmatpush3.msra.mxu0 %v1414_v32  ;;  %1094 = vmatprep.subr.mxu1 %v417_v31  ;;  %v311_v27 = vsub.f32 %v1780_v47, %v2036_v40  ;;  %v2085_v31 = vld [vmem:[#allocation16_spill] sm:$0xff]  ;;  %v2091_v40 = vld [vmem:[#allocation22_spill] sm:$0xff] }
  0x4c   :  { %1105 = vmatprep.subr.mxu0 %v1423_v36  ;;  %1095 = vmatpush3.msra.mxu1 %v305_v35  ;;  %v424_v48 = vand.u32 4294901760, %v423_v45  ;;  %v2086_v35 = vld [vmem:[#allocation17_spill] sm:$0xff]  ;;  %v2087_v45 = vld [vmem:[#allocation18_spill] sm:$0xff]  ;;  %v2107_v36 = vand.u32 4294901760, %v1726_v53 }
  0x4d   :  { %1106 = vmatpush3.msra.mxu0 %v1436_v41  ;;  %v312_v3 = vand.u32 4294901760, %v311_v27  ;;  %v2088_v27 = vld [vmem:[#allocation19_spill] sm:$0xff] }
  0x4e   :  { %1096 = vmatprep.subr.mxu1 %v424_v48  ;;  %1107 = vmatprep.subr.mxu0 %v1450_v46  ;;  %v2089_v48 = vld [vmem:[#allocation20_spill] sm:$0xff] }
  0x4f   :  { %1097 = vmatpush3.msra.mxu1 %v312_v3  ;;  %1108 = vmatpush3.msra.mxu0 %v1476_v60  ;;  %v2090_v3 = vld [vmem:[#allocation21_spill] sm:$0xff] }
  0x50   :  { %429 = vmatmul.mubr.f32.vlgmr.msra.gmra.mxu1 %v1707_v39  ;;  %1109 = vmatprep.subr.mxu0 %v1488_v1  ;;  %v2095_v39 = vld [vmem:[#allocation26_spill] sm:$0xff] }
  0x51   :  { %1136 = vmatprep.subr.mxu1 %v1361_v4  ;;  %1110 = vmatpush3.msra.mxu0 %v1499_v9 }
  0x52   :  { %1137 = vmatpush3.msra.mxu1 %v1363_v5  ;;  %1111 = vmatprep.subr.mxu0 %v1510_v43 }
  0x53   :  { %1138 = vmatprep.subr.mxu1 %v1365_v6  ;;  %1112 = vmatpush3.msra.mxu0 %v1522_v49 }
  0x54   :  { %1139 = vmatpush3.msra.mxu1 %v1367_v10  ;;  %1113 = vmatprep.subr.mxu0 %v1536_v58 }
  0x55   :  { %1140 = vmatprep.subr.mxu1 %v1369_v11  ;;  %1114 = vmatpush3.msra.mxu0 %v1548_v7 }
  0x56   :  { %1141 = vmatpush3.msra.mxu1 %v1371_v12  ;;  %1115 = vmatprep.subr.mxu0 %v1569_v55 }
  0x57   :  { %1142 = vmatprep.subr.mxu1 %v1374_v16  ;;  %1116 = vmatpush3.msra.mxu0 %v1582_v0 }
  0x58   :  { %1143 = vmatpush3.msra.mxu1 %v1376_v17  ;;  %1117 = vmatprep.subr.mxu0 %v1600_v56 }
  0x59   :  { %1144 = vmatprep.subr.mxu1 %v1378_v18  ;;  %1118 = vmatpush3.msra.mxu0 %v1613_v59 }
  0x5a   :  { %1145 = vmatpush3.msra.mxu1 %v1391_v23  ;;  %1119 = vmatprep.subr.mxu0 %v1625_v61 }
  0x5b   :  { %1146 = vmatprep.subr.mxu1 %v2080_v54  ;;  %1120 = vmatpush3.msra.mxu0 %v1636_v28 }
  0x5c   :  { %1147 = vmatpush3.msra.mxu1 %v2081_v30  ;;  %1121 = vmatprep.subr.mxu0 %v2082_v52 }
  0x5d   :  { %1148 = vmatprep.subr.mxu1 %v2083_v21  ;;  %1122 = vmatpush3.msra.mxu0 %v1662_v51 }
  0x5e   :  { %1149 = vmatpush3.msra.mxu1 %v2084_v50  ;;  %1123 = vmatprep.subr.mxu0 %v1681_v22 }
  0x5f   :  { %1150 = vmatprep.subr.mxu1 %v2085_v31  ;;  %1124 = vmatpush3.msra.mxu0 %v1692_v14 }
  0x60   :  { %1151 = vmatpush3.msra.mxu1 %v2086_v35  ;;  %1125 = vmatprep.subr.mxu0 %v1705_v33 }
  0x61   :  { %1152 = vmatprep.subr.mxu1 %v2087_v45  ;;  %1126 = vmatpush3.msra.mxu0 %v1718_v44 }
  0x62   :  { %1153 = vmatpush3.msra.mxu1 %v2088_v27  ;;  %1127 = vmatprep.subr.mxu0 %v1730_v37 }
  0x63   :  { %1154 = vmatprep.subr.mxu1 %v2089_v48  ;;  %1128 = vmatpush3.msra.mxu0 %v1737_v2 }
  0x64   :  { %1155 = vmatpush3.msra.mxu1 %v2090_v3  ;;  %1129 = vmatprep.subr.mxu0 %v1754_v38 }
  0x65   :  { %1156 = vmatprep.subr.mxu1 %v2091_v40  ;;  %1130 = vmatpush3.msra.mxu0 %v1764_v15  ;;  %v2096_v15 = vand.u32 4294901760, %v1394_v24  ;;  %v2103_v24 = vand.u32 4294901760, %v1436_v41  ;;  %v2109_v41 = vand.u32 4294901760, %v1499_v9  ;;  %v2124_v9 = vand.u32 4294901760, %v1705_v33  ;;  %v2138_v33 = vld [vmem:[#allocation25_spill] sm:$0xff] }
  0x66   :  { %1157 = vmatpush3.msra.mxu1 %v2092_v57  ;;  %1131 = vmatprep.subr.mxu0 %v1773_v8  ;;  %v2097_v57 = vld [vmem:[#allocation27_spill] sm:$0xff]  ;;  %v2101_v8 = vld [vmem:[#allocation29_spill] sm:$0xff] }
  0x67   :  { %1158 = vmatprep.subr.mxu1 %v2093_v13  ;;  %1132 = vmatpush3.msra.mxu0 %v1780_v47  ;;  %v2098_v13 = vand.u32 4294901760, %v1400_v26  ;;  %v2099_v47 = vld [vmem:[#allocation28_spill] sm:$0xff]  ;;  %v2104_v26 = vand.u32 4294901760, %v1450_v46  ;;  %v2110_v46 = vand.u32 4294901760, %v1510_v43  ;;  %v2125_v43 = vand.u32 4294901760, %v1718_v44 }
  0x68   :  { %1159 = vmatpush3.msra.mxu1 %v1578_v63  ;;  %567 = vmatmul.mubr.f32.vlgmr.msra.gmra.mxu0 %v1726_v53  ;;  %v2100_v63 = vand.u32 4294901760, %v1414_v32  ;;  %v2105_v32 = vand.u32 4294901760, %v1714_v62  ;;  %v2139_v62 = vld [vmem:[#allocation32_spill] sm:$0xff] }
  0x69   :  { %1160 = vmatprep.subr.mxu1 %v1592_v20  ;;  %1171 = vmatprep.subr.mxu0 %v2094_v34  ;;  %v1027_v34 = vld [vmem:[%s1974_s2] ss:$0 sm:$0xff] }
  0x6a   :  { %1161 = vmatpush3.msra.mxu1 %v2095_v39  ;;  %1172 = vmatpush3.msra.mxu0 %v2096_v15  ;;  %v2108_v15 = vand.u32 4294901760, %v1488_v1  ;;  %v2112_v1 = vand.u32 4294901760, %v1536_v58  ;;  %v2128_v58 = vand.u32 4294901760, %v1754_v38 }
  0x6b   :  { %1162 = vmatprep.subr.mxu1 %v2097_v57  ;;  %1173 = vmatprep.subr.mxu0 %v2098_v13 }
  0x6c   :  { %1163 = vmatpush3.msra.mxu1 %v2099_v47  ;;  %1174 = vmatpush3.msra.mxu0 %v2100_v63  ;;  %v2106_v63 = vand.u32 4294901760, %v1476_v60  ;;  %v2111_v60 = vand.u32 4294901760, %v1522_v49  ;;  %v2126_v49 = vand.u32 4294901760, %v1730_v37 }
  0x6d   :  { %1164 = vmatprep.subr.mxu1 %v2101_v8  ;;  %1175 = vmatprep.subr.mxu0 %v2102_v19 }
  0x6e   :  { %1165 = vmatpush3.msra.mxu1 %v1658_v29  ;;  %1176 = vmatpush3.msra.mxu0 %v2103_v24 }
  0x6f   :  { %1166 = vmatprep.subr.mxu1 %v1672_v42  ;;  %1177 = vmatprep.subr.mxu0 %v2104_v26  ;;  %v1029_v26 = vld [vmem:[#allocation2] ss:$0 sm:$0xff] }
  0x70   :  { %1167 = vmatpush3.msra.mxu1 %v1688_v25  ;;  %671 = vmatprep.mubr.f32.mxu1 %v2105_v32 }
  0x71   :  { %1178 = vmatpush3.msra.mxu0 %v2106_v63  ;;  %675 = vmatmul.mubr.f32.vlgmr.msra.gmra.mxu1 %v2107_v36 }
  0x72   :  { %1179 = vmatprep.subr.mxu0 %v2108_v15  ;;  %1206 = vmatprep.subr.mxu1 %v1361_v4  ;;  %v2113_v4 = vand.u32 4294901760, %v1548_v7  ;;  %v2131_v7 = vld [vmem:[#allocation23_spill] sm:$0xff] }
  0x73   :  { %1180 = vmatpush3.msra.mxu0 %v2109_v41  ;;  %1207 = vmatpush3.msra.mxu1 %v1363_v5  ;;  %v2114_v5 = vand.u32 4294901760, %v1569_v55  ;;  %v2127_v55 = vand.u32 4294901760, %v1737_v2 }
  0x74   :  { %1181 = vmatprep.subr.mxu0 %v2110_v46  ;;  %1208 = vmatprep.subr.mxu1 %v1365_v6  ;;  %v2115_v6 = vand.u32 4294901760, %v1582_v0 }
  0x75   :  { %1182 = vmatpush3.msra.mxu0 %v2111_v60  ;;  %1209 = vmatpush3.msra.mxu1 %v1367_v10  ;;  %v2116_v10 = vand.u32 4294901760, %v1600_v56 }
  0x76   :  { %1183 = vmatprep.subr.mxu0 %v2112_v1  ;;  %1210 = vmatprep.subr.mxu1 %v1369_v11  ;;  %v2117_v11 = vand.u32 4294901760, %v1613_v59  ;;  %v2134_v59 = vld [vmem:[#allocation24_spill] sm:$0xff] }
  0x77   :  { %1184 = vmatpush3.msra.mxu0 %v2113_v4  ;;  %1211 = vmatpush3.msra.mxu1 %v1371_v12  ;;  %v2118_v12 = vand.u32 4294901760, %v1625_v61  ;;  %v2123_v61 = vand.u32 4294901760, %v1692_v14  ;;  %v2137_v14 = vld [vmem:[#allocation31_spill] sm:$0xff] }
  0x78   :  { %1185 = vmatprep.subr.mxu0 %v2114_v5  ;;  %1212 = vmatprep.subr.mxu1 %v1374_v16  ;;  %v2119_v16 = vand.u32 4294901760, %v1636_v28  ;;  %v2132_v28 = vld [vmem:[#allocation34_spill] sm:$0xff] }
  0x79   :  { %1186 = vmatpush3.msra.mxu0 %v2115_v6  ;;  %1213 = vmatpush3.msra.mxu1 %v1376_v17  ;;  %v2120_v17 = vand.u32 4294901760, %v2082_v52  ;;  %v2133_v56 = vand.u32 4294901760, %v2132_v28 }
  0x7a   :  { %1187 = vmatprep.subr.mxu0 %v2116_v10  ;;  %1214 = vmatprep.subr.mxu1 %v1378_v18  ;;  %v2121_v18 = vand.u32 4294901760, %v1662_v51  ;;  %v2135_v51 = vld [vmem:[#allocation35_spill] sm:$0xff] }
  0x7b   :  { %1188 = vmatpush3.msra.mxu0 %v2117_v11  ;;  %1215 = vmatpush3.msra.mxu1 %v1391_v23  ;;  %v2122_v23 = vand.u32 4294901760, %v1681_v22  ;;  %v2129_v22 = vld [vmem:[#allocation33_spill] sm:$0xff]  ;;  %v2136_v2 = vand.u32 4294901760, %v2135_v51 }
  0x7c   :  { %1189 = vmatprep.subr.mxu0 %v2118_v12  ;;  %1216 = vmatprep.subr.mxu1 %v2080_v54  ;;  %v2130_v0 = vand.u32 4294901760, %v2129_v22 }
  0x7d   :  { %1190 = vmatpush3.msra.mxu0 %v2119_v16  ;;  %1217 = vmatpush3.msra.mxu1 %v2081_v30 }
  0x7e   :  { %1191 = vmatprep.subr.mxu0 %v2120_v17  ;;  %1218 = vmatprep.subr.mxu1 %v2083_v21 }
  0x7f   :  { %1192 = vmatpush3.msra.mxu0 %v2121_v18  ;;  %1219 = vmatpush3.msra.mxu1 %v2084_v50 }
  0x80   :  { %1193 = vmatprep.subr.mxu0 %v2122_v23  ;;  %1220 = vmatprep.subr.mxu1 %v2085_v31 }
  0x81   :  { %1194 = vmatpush3.msra.mxu0 %v2123_v61  ;;  %1221 = vmatpush3.msra.mxu1 %v2086_v35 }
  0x82   :  { %1195 = vmatprep.subr.mxu0 %v2124_v9  ;;  %1222 = vmatprep.subr.mxu1 %v2087_v45 }
  0x83   :  { %1196 = vmatpush3.msra.mxu0 %v2125_v43  ;;  %1223 = vmatpush3.msra.mxu1 %v2088_v27 }
  0x84   :  { %1197 = vmatprep.subr.mxu0 %v2126_v49  ;;  %1224 = vmatprep.subr.mxu1 %v2089_v48 }
  0x85   :  { %1198 = vmatpush3.msra.mxu0 %v2127_v55  ;;  %1225 = vmatpush3.msra.mxu1 %v2090_v3  ;;  %v1028_v3 = vld [vmem:[%s1975_s3] ss:$0 sm:$0xff]  ;;  %s1291_s3 = scalar_lea.vmem %s1018_s8, 16 }
  0x86   :  { %1199 = vmatprep.subr.mxu0 %v2128_v58  ;;  %1226 = vmatprep.subr.mxu1 %v2091_v40  ;;  %p1292_p10 = scmp.ne.s32.totalorder %s1018_s8, %s1291_s3  ;;  %p1297_p12 = scmp.lt.s32.totalorder %s1295_s9, %s1291_s3 }
  0x87   :  { %1200 = vmatpush3.msra.mxu0 %v2130_v0  ;;  %1227 = vmatpush3.msra.mxu1 %v2131_v7 }
  0x88   :  { %1201 = vmatprep.subr.mxu0 %v2133_v56  ;;  %1228 = vmatprep.subr.mxu1 %v2134_v59  ;;  %p1298_p13 = por %p1297_p12, %p1296_p11 }
  0x89   :  { %1202 = vmatpush3.msra.mxu0 %v2136_v2  ;;  %841 = vmatprep.mubr.f32.mxu0 %v2137_v14 }
  0x8a   :  { %1229 = vmatpush3.msra.mxu1 %v2138_v33  ;;  %843 = vmatmul.mubr.f32.vlgmr.msra.gmra.mxu0 %v2139_v62  ;;  %p1299_p0 = pnand %p1298_p13, %p1292_p10 }
  0x8b   :  { %1230 = vmatprep.subr.mxu1 %v1592_v20  ;;  %945 = vmatprep.mubr.f32.mxu1 %v2137_v14 }
  0x8c   :  { %1231 = vmatpush3.msra.mxu1 %v2095_v39 }
  0x8d   :  { %1232 = vmatprep.subr.mxu1 %v2097_v57 }
  0x8e   :  { %1233 = vmatpush3.msra.mxu1 %v2099_v47 }
  0x8f   :  { %1234 = vmatprep.subr.mxu1 %v2101_v8 }
  0x90   :  { %1235 = vmatpush3.msra.mxu1 %v1658_v29 }
  0x91   :  { %1236 = vmatprep.subr.mxu1 %v1672_v42 }
  0x92   :  { %1237 = vmatpush3.msra.mxu1 %v1688_v25 }
  0x93   :  { %947 = vmatmul.mubr.f32.vlgmr.msra.gmra.mxu1 %v2139_v62 }
 0x108   :  { %v1063_v44 = vpop.f32.mrf.mxu0 }
 0x10a   :  { %v1064_v20 = vpop.f32.mrf.mxu0 }
 0x10b   :  { %v1065_v39 = vadd.f32 %v1064_v20, %v1063_v44 }
 0x10d   :  { %v199_v29 = vadd.f32 %v1065_v39, %v1027_v34 }
 0x110   :  { %v1098_v53 = vpop.f32.mrf.mxu1 }
 0x112   :  { %v1099_v38 = vpop.f32.mrf.mxu1 }
 0x113   :  { %v1100_v57 = vadd.f32 %v1099_v38, %v1098_v53 }
 0x115   :  { %v431_v54 = vadd.f32 %v1100_v57, %v199_v29 }
 0x128   :  { %v1133_v37 = vpop.f32.mrf.mxu0 }
 0x12a   :  { %v1134_v13 = vpop.f32.mrf.mxu0 }
 0x12b   :  { %v1135_v40 = vadd.f32 %v1134_v13, %v1133_v37 }
 0x12d   :  { %v569_v52 = vadd.f32 %v1135_v40, %v431_v54 }
 0x131   :  { %v1168_v8 = vpop.f32.mrf.mxu1 }
 0x133   :  { %v1169_v42 = vpop.f32.mrf.mxu1 }
 0x134   :  { %v1170_v30 = vadd.f32 %v1169_v42, %v1168_v8 }
 0x136   :  { %v677_v31 = vadd.f32 %v1170_v30, %v569_v52 }
 0x14a   :  { %v1203_v47 = vpop.f32.mrf.mxu0 }
 0x14c   :  { %v1204_v25 = vpop.f32.mrf.mxu0 }
 0x14d   :  { %v1205_v21 = vadd.f32 %v1204_v25, %v1203_v47 }
 0x14f   :  { %v845_v45 = vadd.f32 %v1205_v21, %v677_v31 }
 0x153   :  { %v1238_v50 = vpop.f32.mrf.mxu1 }
 0x155   :  { %v1239_v35 = vpop.f32.mrf.mxu1 }
 0x156   :  { %v1240_v27 = vadd.f32 %v1239_v35, %v1238_v50 }
 0x158   :  { %v949_v48 = vadd.f32 %v1240_v27, %v845_v45 }
 0x15a   :  { %v952_v19 = vmax.f32 %v949_v48, 0.0 }
 0x15c   :  { %v960_v24 = vmul.f32 %v1028_v3, %v952_v19 }
 0x15e   :  { %961 = vadd.xlane.f32.xlu0 %v960_v24 }
 0x1e7   :  { %v962_v32 = vpop.xlane.xlu0 %961 }
 0x1e8   :  { %v970_v63 = vadd.f32 %v1029_v26, %v962_v32 }
 0x1ea   :  { %v1030_v36 = vmul.f32 -1.442695, %v970_v63 }
 0x1ec   :  { %1247 = vpow2.f32 %v1030_v36 }
 0x1f9   :  { %v1248_v15 = vpop.eup %1247 }
 0x1fa   :  { %v974_v41 = vadd.f32 1.0, %v1248_v15 }
 0x1fc   :  { %1249 = vrcp.f32 %v974_v41 }
 0x209   :  { %v1250_v46 = vpop.eup %1249 }
 0x20a   :  { %977 = vxpose.xlu0.b32.start.end [1/1] (short) (narrow) %v1250_v46, 8 }
 0x286   :  { %v993_v60 = vpop.trf.xlu0 }
 0x287   :  { %1010 = vst.msk [vmem:[#allocation8] sm:$0x1] %vm1009_vm0, %v993_v60 }
 0x288   :  { %1302 = shalt.err (!%p1299_p0)
}
 0x289   :  { %1020 = dma.vmem_to_hbm [thread:$0]  %s1018_s8, 16, %s1977_s5, [#allocation5]  }
 0x28a   :  { %1315 = dma.done.wait [#allocation5], 16  }
 0x28b   :  { %1316 = vsyncadd [#allocation5], 4294967280 }
 0x28c   :  { %1024 = vsyncpa [#allocation4], 1 }
 0x28d   :  { %1025 = vsyncpa [#allocation7], 1 }
 0x28e   :  { %1026 = vsyncpa [#allocation5], 1 }

</bundles_post_ra>
